<compile_context>
chip_gen: v6e
topology: v6e:2x2x1
jax: 0.10.0
libtpu: 0.0.40
codegen_flags: <defaults>
</compile_context>

<pallas_src>
import math

import jax
import jax.numpy as jnp
from jax.experimental import pallas as pl
from jax.experimental.pallas import tpu as pltpu

_HALF_LOG_2PI = 0.5 * math.log(2.0 * math.pi)


def likelihood_forward(latents, log_std):
    """Parameters of Normal(loc=latents[-1], scale=exp(log_std)).

    latents: f32[T, B, P]; log_std: f32 scalar.
    Returns (loc f32[B, P], scale f32 scalar).  Pure XLA — per perf review,
    a Pallas kernel cannot beat (only match) the plain slice here.
    """
    loc = latents[-1]
    scale = jnp.exp(jnp.asarray(log_std, jnp.float32))
    return loc, scale


def _log_prob_kernel(params_ref, latents_ref, obs_ref, out_ref):
    # params_ref: SMEM f32[2] = [log_scale, inv_scale]
    # latents_ref: VMEM f32[1, tb, P]  -- block pinned to timestep T-1
    # obs_ref, out_ref: VMEM f32[tb, P]
    log_scale = params_ref[0]
    inv_scale = params_ref[1]
    loc = latents_ref[0]                       # (tb, P)
    z = (obs_ref[...] - loc) * inv_scale
    out_ref[...] = (-0.5) * z * z - log_scale - _HALF_LOG_2PI


def _pick_batch_tile(b):
    for tb in (512, 256, 128, 64, 32, 16, 8):
        if b % tb == 0:
            return tb
    return b  # full-dim block (allowed even if < 8)


def likelihood_log_prob(latents, log_std, observations):
    """Fused Normal(latents[-1], exp(log_std)).log_prob(observations).

    Reads the last latent timestep straight from HBM via an index_map pinned
    to block T-1; `loc` is never materialized.
    """
    T, B, P = latents.shape
    assert observations.shape == (B, P)

    log_std = jnp.asarray(log_std, jnp.float32)
    # [log(scale), 1/scale] as SMEM scalars.
    params = jnp.stack([log_std, jnp.exp(-log_std)]).astype(jnp.float32)

    tb = _pick_batch_tile(B)
    nb = B // tb

    return pl.pallas_call(
        _log_prob_kernel,
        out_shape=jax.ShapeDtypeStruct((B, P), jnp.float32),
        grid=(nb,),
        in_specs=[
            # Distribution scalars live in SMEM, passed whole every step.
            pl.BlockSpec(memory_space=pltpu.MemorySpace.SMEM),
            # Last timestep only: block index along T pinned to T-1.
            pl.BlockSpec((1, tb, P), lambda i: (T - 1, i, 0)),
            pl.BlockSpec((tb, P), lambda i: (i, 0)),
        ],
        out_specs=pl.BlockSpec((tb, P), lambda i: (i, 0)),
        compiler_params=pltpu.CompilerParams(
            dimension_semantics=("parallel",),
        ),
    )(params, latents, observations)


if __name__ == "__main__":
    # Deterministic parameter init (module __init__: log_std = log(init_std))
    init_std = 0.7
    log_std = jnp.float32(math.log(init_std))

    # Small aesmc-style latent sequence: T timesteps of [batch, num_particles]
    T, B, P = 8, 8, 128
    key = jax.random.PRNGKey(0)
    k_lat, k_obs = jax.random.split(key)
    latents = jax.random.normal(k_lat, (T, B, P), dtype=jnp.float32)
    observations = jax.random.normal(k_obs, (B, P), dtype=jnp.float32)

    # forward(): distribution parameters (pure XLA slice + scalar exp)
    loc, scale = likelihood_forward(latents, log_std)
    # fused Pallas consumer: Normal(loc, scale).log_prob(observations)
    log_prob = likelihood_log_prob(latents, log_std, observations)
    jax.block_until_ready((loc, scale, log_prob))

    # Reference checks against PyTorch semantics.
    ref_loc = latents[-1]
    ref_scale = jnp.exp(log_std)
    ref_log_prob = (
        -0.5 * ((observations - ref_loc) / ref_scale) ** 2
        - jnp.log(ref_scale)
        - 0.5 * jnp.log(2.0 * jnp.pi)
    )

    assert jnp.allclose(loc, ref_loc), "loc mismatch"
    assert jnp.allclose(scale, ref_scale, rtol=1e-6), "scale mismatch"
    assert jnp.allclose(log_prob, ref_log_prob, rtol=1e-5, atol=1e-5), "log_prob mismatch"
    # scalar scale broadcasts to loc's shape exactly like torch Normal would
    assert jnp.allclose(
        jnp.broadcast_to(scale, (B, P)),
        jnp.full((B, P), ref_scale, dtype=jnp.float32),
    ), "broadcast scale mismatch"

    print("KERNEL_OK")
</pallas_src>

<mosaic_0001>
module attributes {stable_mosaic.version = 11 : i64} {
  func.func @_log_prob_kernel(%arg0: i32, %arg1: memref<2xf32, #tpu.memory_space<smem>>, %arg2: memref<1x8x128xf32, #tpu.memory_space<vmem>>, %arg3: memref<8x128xf32, #tpu.memory_space<vmem>>, %arg4: memref<8x128xf32, #tpu.memory_space<vmem>>) attributes {dimension_semantics = [#tpu.dimension_semantics<parallel>], iteration_bounds = array<i64: 1>, scalar_prefetch = 0 : i64, scratch_operands = 0 : i64, tpu.core_type = #tpu.core_type<tc>, window_params = [{transform_indices = @transform_0, window_bounds = array<i64: 2>}, {transform_indices = @transform_1, window_bounds = array<i64: 1, 8, 128>}, {transform_indices = @transform_2, window_bounds = array<i64: 8, 128>}, {transform_indices = @transform_3, window_bounds = array<i64: 8, 128>}]} {
    %c0 = arith.constant 0 : index
    %0 = memref.load %arg1[%c0] : memref<2xf32, #tpu.memory_space<smem>>
    %c1 = arith.constant 1 : index
    %1 = memref.load %arg1[%c1] : memref<2xf32, #tpu.memory_space<smem>>
    %c0_0 = arith.constant 0 : index
    %c0_1 = arith.constant 0 : index
    %c0_2 = arith.constant 0 : index
    %2 = vector.load %arg2[%c0_0, %c0_1, %c0_2] : memref<1x8x128xf32, #tpu.memory_space<vmem>>, vector<1x8x128xf32>
    %3 = vector.shape_cast %2 : vector<1x8x128xf32> to vector<8x128xf32>
    %c0_3 = arith.constant 0 : index
    %c0_4 = arith.constant 0 : index
    %4 = vector.load %arg3[%c0_3, %c0_4] : memref<8x128xf32, #tpu.memory_space<vmem>>, vector<8x128xf32>
    %5 = arith.subf %4, %3 : vector<8x128xf32>
    %6 = vector.broadcast %1 : f32 to vector<8x128xf32>
    %7 = arith.mulf %5, %6 : vector<8x128xf32>
    %cst = arith.constant -5.000000e-01 : f32
    %8 = vector.broadcast %cst : f32 to vector<8x128xf32>
    %9 = arith.mulf %8, %7 : vector<8x128xf32>
    %10 = arith.mulf %9, %7 : vector<8x128xf32>
    %11 = vector.broadcast %0 : f32 to vector<8x128xf32>
    %12 = arith.subf %10, %11 : vector<8x128xf32>
    %cst_5 = arith.constant 0.918938517 : f32
    %13 = vector.broadcast %cst_5 : f32 to vector<8x128xf32>
    %14 = arith.subf %12, %13 : vector<8x128xf32>
    %c0_6 = arith.constant 0 : index
    %c0_7 = arith.constant 0 : index
    %15 = vector.load %arg4[%c0_6, %c0_7] : memref<8x128xf32, #tpu.memory_space<vmem>>, vector<8x128xf32>
    tpu.vector_store %arg4[%c0_6, %c0_7], %14 {strides = array<i32>} : memref<8x128xf32, #tpu.memory_space<vmem>>, vector<8x128xf32>,
    return
  }
  func.func @transform_0(%arg0: i32) -> i32 {
    %c0_i32 = arith.constant 0 : i32
    %c0_i32_0 = arith.constant 0 : i32
    return %c0_i32 : i32
  }
  func.func @transform_1(%arg0: i32) -> (i32, i32, i32) {
    %c7_i32 = arith.constant 7 : i32
    %c0_i32 = arith.constant 0 : i32
    %c0_i32_0 = arith.constant 0 : i32
    return %c7_i32, %arg0, %c0_i32 : i32, i32, i32
  }
  func.func @transform_2(%arg0: i32) -> (i32, i32) {
    %c0_i32 = arith.constant 0 : i32
    %c0_i32_0 = arith.constant 0 : i32
    return %arg0, %c0_i32 : i32, i32
  }
  func.func @transform_3(%arg0: i32) -> (i32, i32) {
    %c0_i32 = arith.constant 0 : i32
    %c0_i32_0 = arith.constant 0 : i32
    return %arg0, %c0_i32 : i32, i32
  }
}

</mosaic_0001>

<bundles_post_ra>
// kernel: tpu_custom_call.1
= control target key start
LH: loop header
LB: loop body
LE: loop exit
PB: predicated region body
PF: predicated region fallthrough
CT: control target
= control target key end

     0   :  { %8 = vsyncpa [#allocation5], 0  ;;  %s202_s0 = inlined_call_operand.hbm [shape: f32[2], index: 0, kind: input, shape index: {}]   ;;  %s203_s1 = inlined_call_operand.hbm [shape: f32[8,8,128], index: 1, kind: input, shape index: {}]   ;;  %s204_s2 = inlined_call_operand.hbm [shape: f32[8,128], index: 2, kind: input, shape index: {}]   ;;  %s205_s3 = inlined_call_operand.hbm [shape: f32[8,128], index: 3, kind: output, shape index: {}]  }
   0x1   :  { %9 = vsyncpa [#allocation3], 0 }
   0x2   :  { %10 = vsyncpa [#allocation8], 0 }
   0x3   :  { %11 = vsyncpa [#allocation4], 0  ;;  %s25_s14 = scalar_lea.hbm %s203_s1, 896  ;;  %s166_s15 = smov [#allocation2]  }
   0x4   :  { %19 = dma.hbm_to_smem %s202_s0, 16, %s166_s15, [#allocation5]  }
   0x5   :  { %s167_s18 = smov [#allocation6]   ;;  %s168_s20 = smov [#allocation7]  }
   0x6   :  { %s27_s19 = sshll.u32 %s167_s18, 4  ;;  %s37_s21 = sshll.u32 %s168_s20, 4  ;;  %s28_s19 = int_to_ptr.vmem [resolvable:$true] %s27_s19  ;;  %s38_s21 = int_to_ptr.vmem [resolvable:$true] %s37_s21 }
   0x7   :  { %s105_s22 = scalar_lea.vmem %s28_s19, 128  ;;  %p110_p1 = scmp.lt.s32.totalorder %s28_s19, %s28_s19 }
   0x8   :  { %p106_p0 = scmp.ne.s32.totalorder %s28_s19, %s105_s22  ;;  %p111_p2 = scmp.lt.s32.totalorder %s105_s22, %s105_s22 }
   0xa   :  { %p112_p3 = por %p111_p2, %p110_p1 }
   0xc   :  { %p113_p4 = pnand %p112_p3, %p106_p0 }
   0xe   :  { %116 = shalt.err (!%p113_p4)
}
   0xf   :  { %30 = dma.hbm_to_vmem [thread:$0]  %s25_s14, 128, %s28_s19, [#allocation3]  }
  0x10   :  { %s126_s1 = scalar_lea.vmem %s38_s21, 128  ;;  %p131_p6 = scmp.lt.s32.totalorder %s38_s21, %s38_s21 }
  0x11   :  { %p127_p5 = scmp.ne.s32.totalorder %s38_s21, %s126_s1  ;;  %p132_p7 = scmp.lt.s32.totalorder %s126_s1, %s126_s1 }
  0x13   :  { %p133_p8 = por %p132_p7, %p131_p6 }
  0x15   :  { %p134_p9 = pnand %p133_p8, %p127_p5 }
  0x17   :  { %137 = shalt.err (!%p134_p9)
}
  0x18   :  { %40 = dma.hbm_to_vmem [thread:$0]  %s204_s2, 128, %s38_s21, [#allocation8]  }
  0x19   :  { %158 = dma.done.wait [#allocation5], 16  }
  0x1a   :  { %159 = vsyncadd [#allocation5], 4294967280 }
  0x1b   :  { %160 = dma.done.wait [#allocation3], 128  }
  0x1c   :  { %161 = vsyncadd [#allocation3], 4294967168 }
  0x1d   :  { %162 = dma.done.wait [#allocation8], 128  }
  0x1e   :  { %163 = vsyncadd [#allocation8], 4294967168 }
  0x1f   :  { %50 = sfence }
  0x20   :  { %s81_s24 = sld [smem:[#allocation2 + $0x1]]  ;;  %v53_v0 = vld [vmem:[#allocation6] sm:$0xff]  ;;  %v54_v1 = vld [vmem:[#allocation7] sm:$0xff]  ;;  %s169_s26 = smov [#allocation9]  }
  0x21   :  { %s51_s25 = sld [smem:[#allocation2]]  ;;  %v55_v2 = vsub.f32 %v54_v1, %v53_v0  ;;  %s70_s27 = sshll.u32 %s169_s26, 4  ;;  %s71_s27 = int_to_ptr.vmem [resolvable:$true] %s70_s27 }
  0x22   :  { %s138_s2 = scalar_lea.vmem %s71_s27, 128  ;;  %p143_p11 = scmp.lt.s32.totalorder %s71_s27, %s71_s27 }
  0x23   :  { %p139_p10 = scmp.ne.s32.totalorder %s71_s27, %s138_s2  ;;  %p144_p12 = scmp.lt.s32.totalorder %s138_s2, %s138_s2 }
  0x25   :  { %p145_p13 = por %p144_p12, %p143_p11 }
  0x26   :  { %v56_v3 = vstv %s81_s24 }
  0x27   :  { %v57_v4 = vmul.f32 %v56_v3, %v55_v2  ;;  %v60_v6 = vstv %s51_s25  ;;  %p146_p0 = pnand %p145_p13, %p139_p10 }
  0x29   :  { %v58_v5 = vmul.f32 -0.5, %v57_v4 }
  0x2b   :  { %v59_v7 = vmul.f32 %v58_v5, %v57_v4 }
  0x2d   :  { %v61_v8 = vsub.f32 %v59_v7, %v60_v6 }
  0x2f   :  { %v82_v9 = vadd.f32 -0.9189385, %v61_v8 }
  0x31   :  { %63 = vst [vmem:[#allocation9] sm:$0xff] %v82_v9 }
  0x32   :  { %149 = shalt.err (!%p146_p0)
}
  0x33   :  { %73 = dma.vmem_to_hbm [thread:$0]  %s71_s27, 128, %s205_s3, [#allocation4]  }
  0x34   :  { %164 = dma.done.wait [#allocation4], 128  }
  0x35   :  { %165 = vsyncadd [#allocation4], 4294967168 }
  0x36   :  { %77 = vsyncpa [#allocation3], 1 }
  0x37   :  { %78 = vsyncpa [#allocation8], 1 }
  0x38   :  { %79 = vsyncpa [#allocation4], 1 }
  0x39   :  { %80 = vsyncpa [#allocation5], 1 }

</bundles_post_ra>
